<compile_context>
chip_gen: v7x
topology: tpu7x:2x2x1
jax: 0.10.0
libtpu: 0.0.40
codegen_flags: <defaults>
</compile_context>

<pallas_src>
import jax
import jax.numpy as jnp
from jax.experimental import pallas as pl
from jax.experimental.pallas import tpu as pltpu


def _round_up(x, m):
    return (x + m - 1) // m * m


# ----------------------------------------------------------------------------
# Pallas kernel: one (batch-block, time-chunk) grid step of the recurrence
# ----------------------------------------------------------------------------
def rnn_kernel(x_ref, lens_ref, wih_ref, whh_ref, out_ref, final_ref, h_ref):
    # x_ref     : (TT, B_blk, E)       time-major input chunk (input dtype)
    # lens_ref  : (B_blk, 1)     int32 per-sequence valid lengths
    # wih_ref   : (E, H_pad)     bf16  W_ih^T, zero-padded along H
    # whh_ref   : (H_pad, H_pad) bf16  W_hh^T, zero-padded along both dims
    # out_ref   : (TT, B_blk, H_pad)   per-step hidden states (zero past len)
    # final_ref : (B_blk, H_pad)       hidden state at the last valid step
    # h_ref     : (B_blk, H_pad) f32   VMEM scratch: carried hidden state
    tt_steps, b_blk, e = x_ref.shape
    h_pad = whh_ref.shape[0]
    t_chunk = pl.program_id(1)

    # Reset carried hidden state at the first time chunk of each batch block.
    @pl.when(t_chunk == 0)
    def _():
        h_ref[...] = jnp.zeros_like(h_ref)

    # Hoisted input projection: one MXU-friendly matmul for the whole chunk.
    # Collapsing (TT, B_blk) -> (TT*B_blk) is layout-preserving (B_blk is a
    # multiple of 8), so each xw[tt] below is a contiguous (B_blk, H_pad) slab.
    x2 = x_ref[...].reshape(tt_steps * b_blk, e).astype(jnp.bfloat16)
    xw = jnp.dot(x2, wih_ref[...], preferred_element_type=jnp.float32)
    xw = xw.astype(jnp.bfloat16).reshape(tt_steps, b_blk, h_pad)

    # TODO(synk): keep W_hh resident in MXU weight registers across the chunk
    # (pltpu.matmul_push_rhs / matmul_acc_lhs / matmul_pop) to shave the
    # per-step weight re-push off the serial critical path.
    whh = whh_ref[...]                     # (H_PAD, H_PAD) bf16, kept resident

    # Hoist the lens broadcast out of the loop (JAX does not CSE
    # broadcast_in_dim); each step then only does a full-width compare.
    lens_b = jnp.broadcast_to(lens_ref[...], (b_blk, h_pad))   # int32
    t0 = t_chunk * tt_steps

    # Serial recurrence over the chunk, statically unrolled so the LLO
    # scheduler can overlap the per-step store / mask with the h@W_hh chain.
    h = h_ref[...]                         # (B_blk, H_pad) f32
    for tt in range(tt_steps):
        pre = xw[tt] + jnp.dot(h.astype(jnp.bfloat16), whh,
                               preferred_element_type=jnp.float32)
        h_new = jnp.tanh(pre)              # f32 VPU/EUP path
        valid = (t0 + tt) < lens_b         # (B_blk, H_pad) bool
        # Packed-sequence semantics: padded steps emit zeros and do NOT
        # advance the hidden state. Time-major => one contiguous,
        # lane/sublane-dense (B_blk, H_pad) store per step.
        out_ref[tt] = jnp.where(valid, h_new, 0.0).astype(out_ref.dtype)
        h = jnp.where(valid, h_new, h)

    h_ref[...] = h

    @pl.when(t_chunk == pl.num_programs(1) - 1)
    def _():
        final_ref[...] = h.astype(final_ref.dtype)


# ----------------------------------------------------------------------------
# Wrapper: padding, weight prep, VMEM-budgeted tiling, grid/BlockSpec plumbing
# ----------------------------------------------------------------------------
def _vmem_footprint_bytes(tt, b_blk, e, h_pad, x_bytes, out_bytes):
    x_blk = 2 * tt * b_blk * e * x_bytes           # double-buffered x chunks
    out_blk = 2 * tt * b_blk * h_pad * out_bytes   # double-buffered out chunks
    weights = (e * h_pad + h_pad * h_pad) * 2      # bf16, single-buffered
    final_blk = 2 * b_blk * h_pad * 4              # final-output block
    h_scratch = b_blk * h_pad * 4                  # carried hidden state
    xw = tt * b_blk * h_pad * (4 + 2)              # f32 matmul result + bf16 copy
    return x_blk + out_blk + weights + final_blk + h_scratch + xw


def dynamic_rnn_forward(feats, seq_lengths, w_ih, w_hh, *,
                        time_block=32, batch_block=64, max_len=None,
                        out_dtype=None, vmem_budget_bytes=56 * 1024 * 1024):
    """feats: (B, T, E) float32, batch-first (PyTorch convention).
       seq_lengths: (B,) int.
       w_ih: (H, E), w_hh: (H, H)  (PyTorch nn.RNN weight shapes, bias-free).
       Returns (unpacked (B, max_len, H), final_output (B, H))."""
    B, T, E = feats.shape
    H = w_ih.shape[0]
    out_dtype = feats.dtype if out_dtype is None else jnp.dtype(out_dtype)

    if max_len is None:
        # NOTE: forces a host sync, so the wrapper is not jittable with traced
        # lengths unless a static max_len is supplied.
        max_len = int(jnp.max(seq_lengths))
    t_out = max(int(max_len), 1)

    # ---- static tile sizing -------------------------------------------------
    H_pad = _round_up(H, 128)                           # lane-dense / MXU N dim
    B_blk = _round_up(min(batch_block, max(B, 1)), 8)   # sublane-aligned batch
    TT = _round_up(min(time_block, t_out), 8)           # time chunk (mult of 8)

    x_bytes = jnp.dtype(feats.dtype).itemsize
    o_bytes = jnp.dtype(out_dtype).itemsize
    # Auto-fit TT / B_blk to a VMEM budget that also holds on v7x (64 MiB/TC).
    while TT > 8 and _vmem_footprint_bytes(TT, B_blk, E, H_pad,
                                           x_bytes, o_bytes) > vmem_budget_bytes:
        TT -= 8
    while B_blk > 8 and _vmem_footprint_bytes(TT, B_blk, E, H_pad,
                                              x_bytes, o_bytes) > vmem_budget_bytes:
        B_blk -= 8

    B_pad = _round_up(max(B, 1), B_blk)
    T_run = _round_up(t_out, TT)                        # only run up to max len

    footprint = _vmem_footprint_bytes(TT, B_blk, E, H_pad, x_bytes, o_bytes)
    vmem_limit = int(min(max(32 * 1024 * 1024, footprint + 8 * 1024 * 1024),
                         112 * 1024 * 1024))

    # ---- pad & relayout operands (time-major x; zero padding is masked) ----
    T_keep = min(T_run, T)
    x_tm = jnp.transpose(feats[:, :T_keep, :], (1, 0, 2))          # (T, B, E)
    x_tm = jnp.pad(x_tm, ((0, T_run - T_keep), (0, B_pad - B), (0, 0)))
    lens = jnp.pad(seq_lengths.astype(jnp.int32),
                   (0, B_pad - B)).reshape(B_pad, 1)
    wih_t = jnp.pad(w_ih.T, ((0, 0), (0, H_pad - H))).astype(jnp.bfloat16)
    whh_t = jnp.pad(w_hh.T, ((0, H_pad - H), (0, H_pad - H))).astype(jnp.bfloat16)

    grid = (B_pad // B_blk, T_run // TT)

    # Weights are fetched once with a constant index map: no double-buffering.
    weight_mode = pl.Buffered(1)

    out_tm, final = pl.pallas_call(
        rnn_kernel,
        out_shape=(
            jax.ShapeDtypeStruct((T_run, B_pad, H_pad), out_dtype),
            jax.ShapeDtypeStruct((B_pad, H_pad), feats.dtype),
        ),
        grid_spec=pltpu.PrefetchScalarGridSpec(
            num_scalar_prefetch=0,
            grid=grid,
            in_specs=[
                pl.BlockSpec((TT, B_blk, E), lambda b, t: (t, b, 0)),      # x (time-major)
                pl.BlockSpec((B_blk, 1), lambda b, t: (b, 0)),             # lens
                pl.BlockSpec((E, H_pad), lambda b, t: (0, 0),
                             pipeline_mode=weight_mode),                   # W_ih^T
                pl.BlockSpec((H_pad, H_pad), lambda b, t: (0, 0),
                             pipeline_mode=weight_mode),                   # W_hh^T
            ],
            out_specs=(
                pl.BlockSpec((TT, B_blk, H_pad), lambda b, t: (t, b, 0)),  # per-step h
                pl.BlockSpec((B_blk, H_pad), lambda b, t: (b, 0)),         # final h
            ),
            scratch_shapes=[pltpu.VMEM((B_blk, H_pad), jnp.float32)],      # carried h
        ),
        compiler_params=pltpu.CompilerParams(
            dimension_semantics=("parallel", "arbitrary"),
            vmem_limit_bytes=vmem_limit,
        ),
    )(x_tm, lens, wih_t, whh_t)

    # Strip padding; return batch-first in the original batch order.
    unpacked = jnp.transpose(out_tm[:t_out, :B, :H], (1, 0, 2)).astype(feats.dtype)
    final_output = final[:B, :H].astype(feats.dtype)
    return unpacked, final_output


# ----------------------------------------------------------------------------
# Deterministic orthogonal init (mirrors torch.nn.init.orthogonal_ semantics)
# ----------------------------------------------------------------------------
def orthogonal(key, shape):
    rows, cols = shape
    a = jax.random.normal(key, (max(rows, cols), min(rows, cols)), jnp.float32)
    q, r = jnp.linalg.qr(a)
    q = q * jnp.sign(jnp.diagonal(r))
    if rows < cols:
        q = q.T
    return q[:rows, :cols].astype(jnp.float32)


# ----------------------------------------------------------------------------
# Pure-JAX reference with identical math (bf16 matmul operands, f32 accum,
# hoisted x@W_ih^T projection held in bf16, like the kernel)
# ----------------------------------------------------------------------------
def reference_forward(feats, seq_lengths, w_ih, w_hh, max_len=None):
    B, T, E = feats.shape
    H = w_ih.shape[0]
    lens = seq_lengths.astype(jnp.int32).reshape(B, 1)
    wih_t = w_ih.T.astype(jnp.bfloat16)
    whh_t = w_hh.T.astype(jnp.bfloat16)
    xw = jnp.dot(feats.astype(jnp.bfloat16).reshape(B * T, E), wih_t,
                 preferred_element_type=jnp.float32)
    xw = xw.astype(jnp.bfloat16).reshape(B, T, H)
    h = jnp.zeros((B, H), jnp.float32)
    outs = []
    for t in range(T):
        pre = (xw[:, t, :].astype(jnp.float32)
               + jnp.dot(h.astype(jnp.bfloat16), whh_t,
                         preferred_element_type=jnp.float32))
        h_new = jnp.tanh(pre)
        valid = t < lens
        outs.append(jnp.where(valid, h_new, 0.0))
        h = jnp.where(valid, h_new, h)
    unpacked = jnp.stack(outs, axis=1).astype(feats.dtype)
    t_out = int(jnp.max(seq_lengths)) if max_len is None else int(max_len)
    return unpacked[:, :t_out, :], h.astype(feats.dtype)


if __name__ == "__main__":
    key = jax.random.PRNGKey(0)
    k_x, k_ih, k_hh, k_x2 = jax.random.split(key, 4)

    # Small deterministic example: dynamicRNN(embed_dim=16, hidden_dim=32)
    B, T, E, H = 2, 8, 16, 32
    feats = jax.random.normal(k_x, (B, T, E), jnp.float32)
    seq_lengths = jnp.array([8, 5], dtype=jnp.int32)

    # nn.RNN(embed_dim, hidden_dim, bias=False): weight_ih_l0 (H,E), weight_hh_l0 (H,H)
    w_ih = orthogonal(k_ih, (H, E))
    w_hh = orthogonal(k_hh, (H, H))

    unpacked, final_output = dynamic_rnn_forward(feats, seq_lengths, w_ih, w_hh)
    jax.block_until_ready((unpacked, final_output))

    ref_unpacked, ref_final = reference_forward(feats, seq_lengths, w_ih, w_hh)
    assert unpacked.shape == (B, int(jnp.max(seq_lengths)), H)
    assert final_output.shape == (B, H)
    assert jnp.allclose(unpacked, ref_unpacked, atol=3e-3, rtol=3e-3), \
        float(jnp.max(jnp.abs(unpacked - ref_unpacked)))
    assert jnp.allclose(final_output, ref_final, atol=3e-3, rtol=3e-3), \
        float(jnp.max(jnp.abs(final_output - ref_final)))

    # Second check: multiple time chunks + batch padding (exercises the carried
    # hidden state across chunks and masking past seq_len / padded rows).
    B2, T2 = 3, 24
    feats2 = jax.random.normal(k_x2, (B2, T2, E), jnp.float32)
    seq_lengths2 = jnp.array([24, 17, 5], dtype=jnp.int32)
    unpacked2, final2 = dynamic_rnn_forward(feats2, seq_lengths2, w_ih, w_hh,
                                            time_block=8)
    jax.block_until_ready((unpacked2, final2))
    ref_unpacked2, ref_final2 = reference_forward(feats2, seq_lengths2, w_ih, w_hh)
    assert unpacked2.shape == (B2, 24, H)
    assert jnp.allclose(unpacked2, ref_unpacked2, atol=3e-3, rtol=3e-3), \
        float(jnp.max(jnp.abs(unpacked2 - ref_unpacked2)))
    assert jnp.allclose(final2, ref_final2, atol=3e-3, rtol=3e-3), \
        float(jnp.max(jnp.abs(final2 - ref_final2)))

    print("KERNEL_OK")
</pallas_src>

<mosaic_0001>
module attributes {stable_mosaic.version = 11 : i64} {
  func.func @rnn_kernel(%arg0: i32, %arg1: i32, %arg2: memref<8x8x16xf32, #tpu.memory_space<vmem>>, %arg3: memref<8x1xi32, #tpu.memory_space<vmem>>, %arg4: memref<16x128xbf16, #tpu.memory_space<vmem>>, %arg5: memref<128x128xbf16, #tpu.memory_space<vmem>>, %arg6: memref<8x8x128xf32, #tpu.memory_space<vmem>>, %arg7: memref<8x128xf32, #tpu.memory_space<vmem>>, %arg8: memref<8x128xf32, #tpu.memory_space<vmem>>) attributes {dimension_semantics = [#tpu.dimension_semantics<parallel>, #tpu.dimension_semantics<arbitrary>], iteration_bounds = array<i64: 1, 1>, scalar_prefetch = 0 : i64, scratch_operands = 1 : i64, tpu.core_type = #tpu.core_type<tc>, window_params = [{transform_indices = @transform_0, window_bounds = array<i64: 8, 8, 16>}, {transform_indices = @transform_1, window_bounds = array<i64: 8, 1>}, {pipeline_mode = #tpu.pipeline_mode<synchronous>, transform_indices = @transform_2, window_bounds = array<i64: 16, 128>}, {pipeline_mode = #tpu.pipeline_mode<synchronous>, transform_indices = @transform_3, window_bounds = array<i64: 128, 128>}, {transform_indices = @transform_4, window_bounds = array<i64: 8, 8, 128>}, {transform_indices = @transform_5, window_bounds = array<i64: 8, 128>}]} {
    %c0_i32 = arith.constant 0 : i32
    %0 = arith.cmpi eq, %arg1, %c0_i32 : i32
    %1 = arith.extui %0 : i1 to i32
    %c0_i32_0 = arith.constant 0 : i32
    %2 = arith.cmpi ne, %1, %c0_i32_0 : i32
    scf.if %2 {
      %cst_49 = arith.constant 0.000000e+00 : f32
      %148 = vector.broadcast %cst_49 : f32 to vector<8x128xf32>
      %c0_50 = arith.constant 0 : index
      %c0_51 = arith.constant 0 : index
      %149 = vector.load %arg8[%c0_50, %c0_51] : memref<8x128xf32, #tpu.memory_space<vmem>>, vector<8x128xf32>
      tpu.vector_store %arg8[%c0_50, %c0_51], %148 {strides = array<i32>} : memref<8x128xf32, #tpu.memory_space<vmem>>, vector<8x128xf32>,
    } else {
    }
    %c0 = arith.constant 0 : index
    %c0_1 = arith.constant 0 : index
    %c0_2 = arith.constant 0 : index
    %3 = vector.load %arg2[%c0, %c0_1, %c0_2] : memref<8x8x16xf32, #tpu.memory_space<vmem>>, vector<8x8x16xf32>
    %4 = vector.shape_cast %3 : vector<8x8x16xf32> to vector<64x16xf32>
    %5 = arith.truncf %4 : vector<64x16xf32> to vector<64x16xbf16>
    %c0_3 = arith.constant 0 : index
    %c0_4 = arith.constant 0 : index
    %6 = vector.load %arg4[%c0_3, %c0_4] : memref<16x128xbf16, #tpu.memory_space<vmem>>, vector<16x128xbf16>
    %cst = arith.constant dense<0.000000e+00> : vector<64x128xf32>
    %7 = tpu.matmul %5, %6, %cst {dimension_numbers = #tpu.dot_dimension_numbers<[1], [0], [0], [1], [0, 0, 1, 1], [], []>} : vector<64x16xbf16>, vector<16x128xbf16>, vector<64x128xf32> -> vector<64x128xf32>
    %8 = arith.truncf %7 : vector<64x128xf32> to vector<64x128xbf16>
    %9 = vector.shape_cast %8 : vector<64x128xbf16> to vector<8x8x128xbf16>
    %c0_5 = arith.constant 0 : index
    %c0_6 = arith.constant 0 : index
    %10 = vector.load %arg5[%c0_5, %c0_6] : memref<128x128xbf16, #tpu.memory_space<vmem>>, vector<128x128xbf16>
    %c0_7 = arith.constant 0 : index
    %c0_8 = arith.constant 0 : index
    %11 = vector.load %arg3[%c0_7, %c0_8] : memref<8x1xi32, #tpu.memory_space<vmem>>, vector<8x1xi32>
    %12 = vector.shape_cast %11 : vector<8x1xi32> to vector<8x1xi32>
    %13 = vector.broadcast %12 : vector<8x1xi32> to vector<8x128xi32>
    %c8_i32 = arith.constant 8 : i32
    %14 = arith.muli %arg1, %c8_i32 : i32
    %c0_9 = arith.constant 0 : index
    %c0_10 = arith.constant 0 : index
    %15 = vector.load %arg8[%c0_9, %c0_10] : memref<8x128xf32, #tpu.memory_space<vmem>>, vector<8x128xf32>
    %16 = vector.extract_strided_slice %9 {offsets = [0, 0, 0], sizes = [1, 8, 128], strides = [1, 1, 1]} : vector<8x8x128xbf16> to vector<1x8x128xbf16>
    %17 = vector.shape_cast %16 : vector<1x8x128xbf16> to vector<8x128xbf16>
    %18 = arith.truncf %15 : vector<8x128xf32> to vector<8x128xbf16>
    %cst_11 = arith.constant dense<0.000000e+00> : vector<8x128xf32>
    %19 = tpu.matmul %18, %10, %cst_11 {dimension_numbers = #tpu.dot_dimension_numbers<[1], [0], [0], [1], [0, 0, 1, 1], [], []>} : vector<8x128xbf16>, vector<128x128xbf16>, vector<8x128xf32> -> vector<8x128xf32>
    %20 = arith.extf %17 : vector<8x128xbf16> to vector<8x128xf32>
    %21 = arith.addf %20, %19 : vector<8x128xf32>
    %22 = math.tanh %21 : vector<8x128xf32>
    %c0_i32_12 = arith.constant 0 : i32
    %23 = arith.addi %14, %c0_i32_12 : i32
    %24 = vector.broadcast %23 : i32 to vector<8x128xi32>
    %25 = arith.cmpi slt, %24, %13 : vector<8x128xi32>
    %cst_13 = arith.constant 0.000000e+00 : f32
    %26 = vector.broadcast %cst_13 : f32 to vector<8x128xf32>
    %27 = arith.select %25, %22, %26 : vector<8x128xi1>, vector<8x128xf32>
    %c0_14 = arith.constant 0 : index
    %c0_15 = arith.constant 0 : index
    %c0_16 = arith.constant 0 : index
    %28 = vector.load %arg6[%c0_14, %c0_15, %c0_16] : memref<8x8x128xf32, #tpu.memory_space<vmem>>, vector<1x8x128xf32>
    %29 = vector.shape_cast %28 : vector<1x8x128xf32> to vector<8x128xf32>
    %30 = vector.shape_cast %27 : vector<8x128xf32> to vector<1x8x128xf32>
    tpu.vector_store %arg6[%c0_14, %c0_15, %c0_16], %30 {strides = array<i32>} : memref<8x8x128xf32, #tpu.memory_space<vmem>>, vector<1x8x128xf32>,
    %31 = arith.select %25, %22, %15 : vector<8x128xi1>, vector<8x128xf32>
    %32 = vector.extract_strided_slice %9 {offsets = [1, 0, 0], sizes = [1, 8, 128], strides = [1, 1, 1]} : vector<8x8x128xbf16> to vector<1x8x128xbf16>
    %33 = vector.shape_cast %32 : vector<1x8x128xbf16> to vector<8x128xbf16>
    %34 = arith.truncf %31 : vector<8x128xf32> to vector<8x128xbf16>
    %cst_17 = arith.constant dense<0.000000e+00> : vector<8x128xf32>
    %35 = tpu.matmul %34, %10, %cst_17 {dimension_numbers = #tpu.dot_dimension_numbers<[1], [0], [0], [1], [0, 0, 1, 1], [], []>} : vector<8x128xbf16>, vector<128x128xbf16>, vector<8x128xf32> -> vector<8x128xf32>
    %36 = arith.extf %33 : vector<8x128xbf16> to vector<8x128xf32>
    %37 = arith.addf %36, %35 : vector<8x128xf32>
    %38 = math.tanh %37 : vector<8x128xf32>
    %c1_i32 = arith.constant 1 : i32
    %39 = arith.addi %14, %c1_i32 : i32
    %40 = vector.broadcast %39 : i32 to vector<8x128xi32>
    %41 = arith.cmpi slt, %40, %13 : vector<8x128xi32>
    %cst_18 = arith.constant 0.000000e+00 : f32
    %42 = vector.broadcast %cst_18 : f32 to vector<8x128xf32>
    %43 = arith.select %41, %38, %42 : vector<8x128xi1>, vector<8x128xf32>
    %c1 = arith.constant 1 : index
    %c0_19 = arith.constant 0 : index
    %c0_20 = arith.constant 0 : index
    %44 = vector.load %arg6[%c1, %c0_19, %c0_20] : memref<8x8x128xf32, #tpu.memory_space<vmem>>, vector<1x8x128xf32>
    %45 = vector.shape_cast %44 : vector<1x8x128xf32> to vector<8x128xf32>
    %46 = vector.shape_cast %43 : vector<8x128xf32> to vector<1x8x128xf32>
    tpu.vector_store %arg6[%c1, %c0_19, %c0_20], %46 {strides = array<i32>} : memref<8x8x128xf32, #tpu.memory_space<vmem>>, vector<1x8x128xf32>,
    %47 = arith.select %41, %38, %31 : vector<8x128xi1>, vector<8x128xf32>
    %48 = vector.extract_strided_slice %9 {offsets = [2, 0, 0], sizes = [1, 8, 128], strides = [1, 1, 1]} : vector<8x8x128xbf16> to vector<1x8x128xbf16>
    %49 = vector.shape_cast %48 : vector<1x8x128xbf16> to vector<8x128xbf16>
    %50 = arith.truncf %47 : vector<8x128xf32> to vector<8x128xbf16>
    %cst_21 = arith.constant dense<0.000000e+00> : vector<8x128xf32>
    %51 = tpu.matmul %50, %10, %cst_21 {dimension_numbers = #tpu.dot_dimension_numbers<[1], [0], [0], [1], [0, 0, 1, 1], [], []>} : vector<8x128xbf16>, vector<128x128xbf16>, vector<8x128xf32> -> vector<8x128xf32>
    %52 = arith.extf %49 : vector<8x128xbf16> to vector<8x128xf32>
    %53 = arith.addf %52, %51 : vector<8x128xf32>
    %54 = math.tanh %53 : vector<8x128xf32>
    %c2_i32 = arith.constant 2 : i32
    %55 = arith.addi %14, %c2_i32 : i32
    %56 = vector.broadcast %55 : i32 to vector<8x128xi32>
    %57 = arith.cmpi slt, %56, %13 : vector<8x128xi32>
    %cst_22 = arith.constant 0.000000e+00 : f32
    %58 = vector.broadcast %cst_22 : f32 to vector<8x128xf32>
    %59 = arith.select %57, %54, %58 : vector<8x128xi1>, vector<8x128xf32>
    %c2 = arith.constant 2 : index
    %c0_23 = arith.constant 0 : index
    %c0_24 = arith.constant 0 : index
    %60 = vector.load %arg6[%c2, %c0_23, %c0_24] : memref<8x8x128xf32, #tpu.memory_space<vmem>>, vector<1x8x128xf32>
    %61 = vector.shape_cast %60 : vector<1x8x128xf32> to vector<8x128xf32>
    %62 = vector.shape_cast %59 : vector<8x128xf32> to vector<1x8x128xf32>
    tpu.vector_store %arg6[%c2, %c0_23, %c0_24], %62 {strides = array<i32>} : memref<8x8x128xf32, #tpu.memory_space<vmem>>, vector<1x8x128xf32>,
    %63 = arith.select %57, %54, %47 : vector<8x128xi1>, vector<8x128xf32>
    %64 = vector.extract_strided_slice %9 {offsets = [3, 0, 0], sizes = [1, 8, 128], strides = [1, 1, 1]} : vector<8x8x128xbf16> to vector<1x8x128xbf16>
    %65 = vector.shape_cast %64 : vector<1x8x128xbf16> to vector<8x128xbf16>
    %66 = arith.truncf %63 : vector<8x128xf32> to vector<8x128xbf16>
    %cst_25 = arith.constant dense<0.000000e+00> : vector<8x128xf32>
    %67 = tpu.matmul %66, %10, %cst_25 {dimension_numbers = #tpu.dot_dimension_numbers<[1], [0], [0], [1], [0, 0, 1, 1], [], []>} : vector<8x128xbf16>, vector<128x128xbf16>, vector<8x128xf32> -> vector<8x128xf32>
    %68 = arith.extf %65 : vector<8x128xbf16> to vector<8x128xf32>
    %69 = arith.addf %68, %67 : vector<8x128xf32>
    %70 = math.tanh %69 : vector<8x128xf32>
    %c3_i32 = arith.constant 3 : i32
    %71 = arith.addi %14, %c3_i32 : i32
    %72 = vector.broadcast %71 : i32 to vector<8x128xi32>
    %73 = arith.cmpi slt, %72, %13 : vector<8x128xi32>
    %cst_26 = arith.constant 0.000000e+00 : f32
    %74 = vector.broadcast %cst_26 : f32 to vector<8x128xf32>
    %75 = arith.select %73, %70, %74 : vector<8x128xi1>, vector<8x128xf32>
    %c3 = arith.constant 3 : index
    %c0_27 = arith.constant 0 : index
    %c0_28 = arith.constant 0 : index
    %76 = vector.load %arg6[%c3, %c0_27, %c0_28] : memref<8x8x128xf32, #tpu.memory_space<vmem>>, vector<1x8x128xf32>
    %77 = vector.shape_cast %76 : vector<1x8x128xf32> to vector<8x128xf32>
    %78 = vector.shape_cast %75 : vector<8x128xf32> to vector<1x8x128xf32>
    tpu.vector_store %arg6[%c3, %c0_27, %c0_28], %78 {strides = array<i32>} : memref<8x8x128xf32, #tpu.memory_space<vmem>>, vector<1x8x128xf32>,
    %79 = arith.select %73, %70, %63 : vector<8x128xi1>, vector<8x128xf32>
    %80 = vector.extract_strided_slice %9 {offsets = [4, 0, 0], sizes = [1, 8, 128], strides = [1, 1, 1]} : vector<8x8x128xbf16> to vector<1x8x128xbf16>
    %81 = vector.shape_cast %80 : vector<1x8x128xbf16> to vector<8x128xbf16>
    %82 = arith.truncf %79 : vector<8x128xf32> to vector<8x128xbf16>
    %cst_29 = arith.constant dense<0.000000e+00> : vector<8x128xf32>
    %83 = tpu.matmul %82, %10, %cst_29 {dimension_numbers = #tpu.dot_dimension_numbers<[1], [0], [0], [1], [0, 0, 1, 1], [], []>} : vector<8x128xbf16>, vector<128x128xbf16>, vector<8x128xf32> -> vector<8x128xf32>
    %84 = arith.extf %81 : vector<8x128xbf16> to vector<8x128xf32>
    %85 = arith.addf %84, %83 : vector<8x128xf32>
    %86 = math.tanh %85 : vector<8x128xf32>
    %c4_i32 = arith.constant 4 : i32
    %87 = arith.addi %14, %c4_i32 : i32
    %88 = vector.broadcast %87 : i32 to vector<8x128xi32>
    %89 = arith.cmpi slt, %88, %13 : vector<8x128xi32>
    %cst_30 = arith.constant 0.000000e+00 : f32
    %90 = vector.broadcast %cst_30 : f32 to vector<8x128xf32>
    %91 = arith.select %89, %86, %90 : vector<8x128xi1>, vector<8x128xf32>
    %c4 = arith.constant 4 : index
    %c0_31 = arith.constant 0 : index
    %c0_32 = arith.constant 0 : index
    %92 = vector.load %arg6[%c4, %c0_31, %c0_32] : memref<8x8x128xf32, #tpu.memory_space<vmem>>, vector<1x8x128xf32>
    %93 = vector.shape_cast %92 : vector<1x8x128xf32> to vector<8x128xf32>
    %94 = vector.shape_cast %91 : vector<8x128xf32> to vector<1x8x128xf32>
    tpu.vector_store %arg6[%c4, %c0_31, %c0_32], %94 {strides = array<i32>} : memref<8x8x128xf32, #tpu.memory_space<vmem>>, vector<1x8x128xf32>,
    %95 = arith.select %89, %86, %79 : vector<8x128xi1>, vector<8x128xf32>
    %96 = vector.extract_strided_slice %9 {offsets = [5, 0, 0], sizes = [1, 8, 128], strides = [1, 1, 1]} : vector<8x8x128xbf16> to vector<1x8x128xbf16>
    %97 = vector.shape_cast %96 : vector<1x8x128xbf16> to vector<8x128xbf16>
    %98 = arith.truncf %95 : vector<8x128xf32> to vector<8x128xbf16>
    %cst_33 = arith.constant dense<0.000000e+00> : vector<8x128xf32>
    %99 = tpu.matmul %98, %10, %cst_33 {dimension_numbers = #tpu.dot_dimension_numbers<[1], [0], [0], [1], [0, 0, 1, 1], [], []>} : vector<8x128xbf16>, vector<128x128xbf16>, vector<8x128xf32> -> vector<8x128xf32>
    %100 = arith.extf %97 : vector<8x128xbf16> to vector<8x128xf32>
    %101 = arith.addf %100, %99 : vector<8x128xf32>
    %102 = math.tanh %101 : vector<8x128xf32>
    %c5_i32 = arith.constant 5 : i32
    %103 = arith.addi %14, %c5_i32 : i32
    %104 = vector.broadcast %103 : i32 to vector<8x128xi32>
    %105 = arith.cmpi slt, %104, %13 : vector<8x128xi32>
    %cst_34 = arith.constant 0.000000e+00 : f32
    %106 = vector.broadcast %cst_34 : f32 to vector<8x128xf32>
    %107 = arith.select %105, %102, %106 : vector<8x128xi1>, vector<8x128xf32>
    %c5 = arith.constant 5 : index
    %c0_35 = arith.constant 0 : index
    %c0_36 = arith.constant 0 : index
    %108 = vector.load %arg6[%c5, %c0_35, %c0_36] : memref<8x8x128xf32, #tpu.memory_space<vmem>>, vector<1x8x128xf32>
    %109 = vector.shape_cast %108 : vector<1x8x128xf32> to vector<8x128xf32>
    %110 = vector.shape_cast %107 : vector<8x128xf32> to vector<1x8x128xf32>
    tpu.vector_store %arg6[%c5, %c0_35, %c0_36], %110 {strides = array<i32>} : memref<8x8x128xf32, #tpu.memory_space<vmem>>, vector<1x8x128xf32>,
    %111 = arith.select %105, %102, %95 : vector<8x128xi1>, vector<8x128xf32>
    %112 = vector.extract_strided_slice %9 {offsets = [6, 0, 0], sizes = [1, 8, 128], strides = [1, 1, 1]} : vector<8x8x128xbf16> to vector<1x8x128xbf16>
    %113 = vector.shape_cast %112 : vector<1x8x128xbf16> to vector<8x128xbf16>
    %114 = arith.truncf %111 : vector<8x128xf32> to vector<8x128xbf16>
    %cst_37 = arith.constant dense<0.000000e+00> : vector<8x128xf32>
    %115 = tpu.matmul %114, %10, %cst_37 {dimension_numbers = #tpu.dot_dimension_numbers<[1], [0], [0], [1], [0, 0, 1, 1], [], []>} : vector<8x128xbf16>, vector<128x128xbf16>, vector<8x128xf32> -> vector<8x128xf32>
    %116 = arith.extf %113 : vector<8x128xbf16> to vector<8x128xf32>
    %117 = arith.addf %116, %115 : vector<8x128xf32>
    %118 = math.tanh %117 : vector<8x128xf32>
    %c6_i32 = arith.constant 6 : i32
    %119 = arith.addi %14, %c6_i32 : i32
    %120 = vector.broadcast %119 : i32 to vector<8x128xi32>
    %121 = arith.cmpi slt, %120, %13 : vector<8x128xi32>
    %cst_38 = arith.constant 0.000000e+00 : f32
    %122 = vector.broadcast %cst_38 : f32 to vector<8x128xf32>
    %123 = arith.select %121, %118, %122 : vector<8x128xi1>, vector<8x128xf32>
    %c6 = arith.constant 6 : index
    %c0_39 = arith.constant 0 : index
    %c0_40 = arith.constant 0 : index
    %124 = vector.load %arg6[%c6, %c0_39, %c0_40] : memref<8x8x128xf32, #tpu.memory_space<vmem>>, vector<1x8x128xf32>
    %125 = vector.shape_cast %124 : vector<1x8x128xf32> to vector<8x128xf32>
    %126 = vector.shape_cast %123 : vector<8x128xf32> to vector<1x8x128xf32>
    tpu.vector_store %arg6[%c6, %c0_39, %c0_40], %126 {strides = array<i32>} : memref<8x8x128xf32, #tpu.memory_space<vmem>>, vector<1x8x128xf32>,
    %127 = arith.select %121, %118, %111 : vector<8x128xi1>, vector<8x128xf32>
    %128 = vector.extract_strided_slice %9 {offsets = [7, 0, 0], sizes = [1, 8, 128], strides = [1, 1, 1]} : vector<8x8x128xbf16> to vector<1x8x128xbf16>
    %129 = vector.shape_cast %128 : vector<1x8x128xbf16> to vector<8x128xbf16>
    %130 = arith.truncf %127 : vector<8x128xf32> to vector<8x128xbf16>
    %cst_41 = arith.constant dense<0.000000e+00> : vector<8x128xf32>
    %131 = tpu.matmul %130, %10, %cst_41 {dimension_numbers = #tpu.dot_dimension_numbers<[1], [0], [0], [1], [0, 0, 1, 1], [], []>} : vector<8x128xbf16>, vector<128x128xbf16>, vector<8x128xf32> -> vector<8x128xf32>
    %132 = arith.extf %129 : vector<8x128xbf16> to vector<8x128xf32>
    %133 = arith.addf %132, %131 : vector<8x128xf32>
    %134 = math.tanh %133 : vector<8x128xf32>
    %c7_i32 = arith.constant 7 : i32
    %135 = arith.addi %14, %c7_i32 : i32
    %136 = vector.broadcast %135 : i32 to vector<8x128xi32>
    %137 = arith.cmpi slt, %136, %13 : vector<8x128xi32>
    %cst_42 = arith.constant 0.000000e+00 : f32
    %138 = vector.broadcast %cst_42 : f32 to vector<8x128xf32>
    %139 = arith.select %137, %134, %138 : vector<8x128xi1>, vector<8x128xf32>
    %c7 = arith.constant 7 : index
    %c0_43 = arith.constant 0 : index
    %c0_44 = arith.constant 0 : index
    %140 = vector.load %arg6[%c7, %c0_43, %c0_44] : memref<8x8x128xf32, #tpu.memory_space<vmem>>, vector<1x8x128xf32>
    %141 = vector.shape_cast %140 : vector<1x8x128xf32> to vector<8x128xf32>
    %142 = vector.shape_cast %139 : vector<8x128xf32> to vector<1x8x128xf32>
    tpu.vector_store %arg6[%c7, %c0_43, %c0_44], %142 {strides = array<i32>} : memref<8x8x128xf32, #tpu.memory_space<vmem>>, vector<1x8x128xf32>,
    %143 = arith.select %137, %134, %127 : vector<8x128xi1>, vector<8x128xf32>
    %c0_45 = arith.constant 0 : index
    %c0_46 = arith.constant 0 : index
    %144 = vector.load %arg8[%c0_45, %c0_46] : memref<8x128xf32, #tpu.memory_space<vmem>>, vector<8x128xf32>
    tpu.vector_store %arg8[%c0_45, %c0_46], %143 {strides = array<i32>} : memref<8x128xf32, #tpu.memory_space<vmem>>, vector<8x128xf32>,
    %c0_i32_47 = arith.constant 0 : i32
    %145 = arith.cmpi eq, %arg1, %c0_i32_47 : i32
    %146 = arith.extui %145 : i1 to i32
    %c0_i32_48 = arith.constant 0 : i32
    %147 = arith.cmpi ne, %146, %c0_i32_48 : i32
    scf.if %147 {
      %c0_49 = arith.constant 0 : index
      %c0_50 = arith.constant 0 : index
      %148 = vector.load %arg7[%c0_49, %c0_50] : memref<8x128xf32, #tpu.memory_space<vmem>>, vector<8x128xf32>
      tpu.vector_store %arg7[%c0_49, %c0_50], %143 {strides = array<i32>} : memref<8x128xf32, #tpu.memory_space<vmem>>, vector<8x128xf32>,
    } else {
    }
    return
  }
  func.func @transform_0(%arg0: i32, %arg1: i32) -> (i32, i32, i32) {
    %c0_i32 = arith.constant 0 : i32
    %c0_i32_0 = arith.constant 0 : i32
    return %arg1, %arg0, %c0_i32 : i32, i32, i32
  }
  func.func @transform_1(%arg0: i32, %arg1: i32) -> (i32, i32) {
    %c0_i32 = arith.constant 0 : i32
    %c0_i32_0 = arith.constant 0 : i32
    return %arg0, %c0_i32 : i32, i32
  }
  func.func @transform_2(%arg0: i32, %arg1: i32) -> (i32, i32) {
    %c0_i32 = arith.constant 0 : i32
    %c0_i32_0 = arith.constant 0 : i32
    %c0_i32_1 = arith.constant 0 : i32
    return %c0_i32, %c0_i32_0 : i32, i32
  }
  func.func @transform_3(%arg0: i32, %arg1: i32) -> (i32, i32) {
    %c0_i32 = arith.constant 0 : i32
    %c0_i32_0 = arith.constant 0 : i32
    %c0_i32_1 = arith.constant 0 : i32
    return %c0_i32, %c0_i32_0 : i32, i32
  }
  func.func @transform_4(%arg0: i32, %arg1: i32) -> (i32, i32, i32) {
    %c0_i32 = arith.constant 0 : i32
    %c0_i32_0 = arith.constant 0 : i32
    return %arg1, %arg0, %c0_i32 : i32, i32, i32
  }
  func.func @transform_5(%arg0: i32, %arg1: i32) -> (i32, i32) {
    %c0_i32 = arith.constant 0 : i32
    %c0_i32_0 = arith.constant 0 : i32
    return %arg0, %c0_i32 : i32, i32
  }
}

</mosaic_0001>

<bundles_post_ra>
// kernel: tpu_custom_call.1
= control target key start
LH: loop header
LB: loop body
LE: loop exit
PB: predicated region body
PF: predicated region fallthrough
CT: control target
= control target key end

     0   :  { %11 = vsyncpa [#allocation4], 0  ;;  %s1419_s0 = inlined_call_operand.hbm [shape: f32[8,8,16], index: 0, kind: input, shape index: {}]   ;;  %s1420_s1 = inlined_call_operand.vmem [shape: s32[8,1], index: 1, kind: input, shape index: {}]   ;;  %s1421_s2 = inlined_call_operand.vmem [shape: bf16[16,128], index: 2, kind: input, shape index: {}]   ;;  %s1422_s3 = inlined_call_operand.hbm [shape: bf16[128,128], index: 3, kind: input, shape index: {}]   ;;  %s1423_s4 = inlined_call_operand.hbm [shape: f32[8,8,128], index: 4, kind: output, shape index: {0}]   ;;  %s1424_s5 = inlined_call_operand.hbm [shape: f32[8,128], index: 5, kind: output, shape index: {1}]  }
   0x1   :  { %12 = vsyncpa [#allocation7], 0 }
   0x2   :  { %13 = vsyncpa [#allocation5], 0 }
   0x3   :  { %14 = vsyncpa [#allocation10], 0  ;;  %s1119_s18 = smov [#allocation3]   ;;  %s1023_s22 = scalar_lea.hbm %s1419_s0, 1024 }
   0x4   :  { %s20_s19 = sshll.u32 %s1119_s18, 4  ;;  %p1024_p0 = scmp.ne.s32.totalorder %s1419_s0, %s1023_s22  ;;  %s21_s19 = int_to_ptr.vmem [resolvable:$true] %s20_s19 }
   0x5   :  { %p1027_p1 = scmp.lt.u32.totalorder %s1023_s22, %s1419_s0 }
   0x7   :  { %p1029_p2 = pnand %p1027_p1, %p1024_p0 }
   0x9   :  { %1032 = shalt.err (!%p1029_p2)
}
   0xa   :  { %s1033_s27 = scalar_lea.vmem %s21_s19, 1024  ;;  %p1038_p4 = scmp.lt.s32.totalorder %s21_s19, %s21_s19 }
   0xb   :  { %p1034_p3 = scmp.ne.s32.totalorder %s21_s19, %s1033_s27  ;;  %p1039_p5 = scmp.lt.s32.totalorder %s1033_s27, %s1033_s27 }
   0xd   :  { %p1040_p6 = por %p1039_p5, %p1038_p4 }
   0xf   :  { %p1041_p7 = pnand %p1040_p6, %p1034_p3 }
  0x11   :  { %1044 = shalt.err (!%p1041_p7)
}
  0x12   :  { %s1120_s28 = smov 128   ;;  %s1121_s29 = smov 8  }
  0x13   :  { %26 = dma.hbm_to_vmem [thread:$0]  %s1419_s0, 1024, %s21_s19, [#allocation4], %s1120_s28, %s1120_s28, %s1121_s29  }
  0x14   :  { %s1122_s7 = smov [#allocation6]   ;;  %s1045_s11 = scalar_lea.hbm %s1422_s3, 1024 }
  0x15   :  { %s36_s8 = sshll.u32 %s1122_s7, 4  ;;  %p1046_p8 = scmp.ne.s32.totalorder %s1422_s3, %s1045_s11  ;;  %s37_s8 = int_to_ptr.vmem [resolvable:$true] %s36_s8 }
  0x16   :  { %p1049_p9 = scmp.lt.u32.totalorder %s1045_s11, %s1422_s3 }
  0x18   :  { %p1051_p10 = pnand %p1049_p9, %p1046_p8 }
  0x1a   :  { %1054 = shalt.err (!%p1051_p10)
}
  0x1b   :  { %s1055_s16 = scalar_lea.vmem %s37_s8, 1024  ;;  %p1060_p12 = scmp.lt.s32.totalorder %s37_s8, %s37_s8 }
  0x1c   :  { %p1056_p11 = scmp.ne.s32.totalorder %s37_s8, %s1055_s16  ;;  %p1061_p13 = scmp.lt.s32.totalorder %s1055_s16, %s1055_s16 }
  0x1e   :  { %p1062_p0 = por %p1061_p13, %p1060_p12 }
  0x20   :  { %p1063_p1 = pnand %p1062_p0, %p1056_p11 }
  0x22   :  { %1066 = shalt.err (!%p1063_p1)
}
  0x23   :  { %s1123_s0 = smov 64   ;;  %s1124_s17 = smov 4  }
  0x24   :  { %42 = dma.hbm_to_vmem [thread:$0]  %s1422_s3, 1024, %s37_s8, [#allocation7], %s1123_s0, %s1123_s0, %s1124_s17  }
  0x25   :  { %1111 = dma.done.wait [#allocation4], 1024  }
  0x26   :  { %1112 = vsyncadd [#allocation4], 4294966272 }
  0x27   :  { %1113 = dma.done.wait [#allocation7], 1024  }
  0x28   :  { %1114 = vsyncadd [#allocation7], 4294966272  ;;  %v1125_v0 = vmov 0.0   ;;  %vm1126_vm0 = vmmov 0   ;;  %v1127_v1 = vmov 0   ;;  %v1191_v2 = vld [vmem:[#allocation6] sm:$0xff]  }
  0x29   :  { %825 = vmatprep.subr.bf16.mxu1 %v1125_v0  ;;  %841 = vmatprep.mubr.msk.bf16.mxu1 %vm1126_vm0, %v1125_v0  ;;  %v1194_v3 = vld [vmem:[#allocation6 + $0x8] sm:$0xff]   ;;  %v1003_v4 = vld [vmem:[%s1421_s2] sm:$0xff]   ;;  %v1201_v5 = vld [vmem:[#allocation6 + $0x10] sm:$0xff]   ;;  %vm75_vm1 = vcmask 130048   ;;  %v1128_v18 = vmov 0.0|0.0   ;;  %s1130_s23 = smov [#allocation9]  }
  0x2a   :  { %997 = vset.pattern.permute.xlu0 %v1127_v1  ;;  %826 = vmatpush3.bf16.msra.mxu1 %v1191_v2  ;;  %v55_v6 = vld [vmem:[#allocation3] sm:$0xff]  ;;  %v56_v7 = vld [vmem:[#allocation3 + $0x8] sm:$0xff]  ;;  %v57_v8 = vld [vmem:[#allocation3 + $0x10] sm:$0xff]  ;;  %s684_s24 = sshll.u32 %s1130_s23, 4  ;;  %s685_s24 = int_to_ptr.vmem [resolvable:$true] %s684_s24 }
  0x2b   :  { %827 = vmatprep.subr.bf16.mxu1 %v1125_v0  ;;  %815 = vmatprep.subr.bf16.mxu0 %v1003_v4  ;;  %v63_v9 = vpack.c.bf16 %v56_v7, %v55_v6  ;;  %v58_v10 = vld [vmem:[#allocation3 + $0x18] sm:$0xff]  ;;  %v201_v13 = vld [vmem:[%s1420_s1] sm:$0xff]  ;;  %v1223_v15 = vld [vmem:[#allocation6 + $0x28] sm:$0xff]   ;;  %s1129_s1 = smov [#allocation8]  }
  0x2c   :  { %816 = vmatpush3.bf16.msra.mxu0 %v1003_v4  ;;  %v64_v11 = vpack.c.bf16 %v58_v10, %v57_v8  ;;  %v1206_v12 = vld [vmem:[#allocation6 + $0x18] sm:$0xff]   ;;  %203 = vperm.xlu0 %997, %v201_v13   ;;  %v1217_v14 = vld [vmem:[#allocation6 + $0x20] sm:$0xff]   ;;  %v1229_v16 = vld [vmem:[#allocation6 + $0x30] sm:$0xff]   ;;  %s671_s22 = sshll.u32 %s1129_s1, 4  ;;  %s672_s22 = int_to_ptr.vmem [resolvable:$true] %s671_s22 }
  0x2d   :  { %845 = vmatprep.subr.bf16.mxu0 %v1125_v0  ;;  %817 = vmatprep.mubr.msk.bf16.mxu0 %vm75_vm1, %v63_v9  ;;  %v1235_v17 = vld [vmem:[#allocation6 + $0x38] sm:$0xff]   ;;  %v59_v19 = vld [vmem:[#allocation3 + $0x20] sm:$0xff]  ;;  %v60_v20 = vld [vmem:[#allocation3 + $0x28] sm:$0xff]  ;;  %s1067_s25 = scalar_lea.vmem %s672_s22, 1024  ;;  %p1072_p3 = scmp.lt.s32.totalorder %s672_s22, %s672_s22 }
  0x2e   :  { %828 = vmatpush3.bf16.msra.mxu1 %v1194_v3  ;;  %v65_v21 = vpack.c.bf16 %v60_v20, %v59_v19  ;;  %v61_v22 = vld [vmem:[#allocation3 + $0x30] sm:$0xff]  ;;  %v62_v23 = vld [vmem:[#allocation3 + $0x38] sm:$0xff]  ;;  %p1068_p2 = scmp.ne.s32.totalorder %s672_s22, %s1067_s25  ;;  %p1073_p4 = scmp.lt.s32.totalorder %s1067_s25, %s1067_s25 }
  0x2f   :  { %829 = vmatprep.subr.bf16.mxu1 %v1125_v0  ;;  %818 = vmatmul.mubr.msk.bf16.vlgmr.msra.gmra.mrb[0].mxu0 %vm75_vm1, %v64_v11  ;;  %v66_v24 = vpack.c.bf16 %v62_v23, %v61_v22 }
  0x30   :  { %846 = vmatpush3.bf16.msra.mxu0 %v1191_v2  ;;  %821 = vmatprep.mubr.msk.bf16.mxu0 %vm75_vm1, %v65_v21  ;;  %p1074_p5 = por %p1073_p4, %p1072_p3 }
  0x31   :  { %847 = vmatprep.subr.bf16.mxu0 %v1125_v0 }
  0x32   :  { %830 = vmatpush3.bf16.msra.mxu1 %v1201_v5  ;;  %p1075_p6 = pnand %p1074_p5, %p1068_p2 }
  0x33   :  { %831 = vmatprep.subr.bf16.mxu1 %v1125_v0 }
  0x34   :  { %848 = vmatpush3.bf16.msra.mxu0 %v1194_v3 }
  0x35   :  { %849 = vmatprep.subr.bf16.mxu0 %v1125_v0 }
  0x36   :  { %832 = vmatpush3.bf16.msra.mxu1 %v1206_v12 }
  0x37   :  { %833 = vmatprep.subr.bf16.mxu1 %v1125_v0  ;;  %822 = vmatmul.mubr.msk.bf16.gmra.mrb[4].mxu0 %vm75_vm1, %v66_v24 }
  0x38   :  { %850 = vmatpush3.bf16.msra.mxu0 %v1201_v5  ;;  %861 = vmatprep.mubr.msk.bf16.mxu0 %vm1126_vm0, %v1125_v0 }
  0x39   :  { %851 = vmatprep.subr.bf16.mxu0 %v1125_v0 }
  0x3a   :  { %834 = vmatpush3.bf16.msra.mxu1 %v1217_v14 }
  0x3b   :  { %835 = vmatprep.subr.bf16.mxu1 %v1125_v0 }
  0x3c   :  { %852 = vmatpush3.bf16.msra.mxu0 %v1206_v12 }
  0x3d   :  { %853 = vmatprep.subr.bf16.mxu0 %v1125_v0 }
  0x3e   :  { %836 = vmatpush3.bf16.msra.mxu1 %v1223_v15 }
  0x3f   :  { %837 = vmatprep.subr.bf16.mxu1 %v1125_v0 }
  0x40   :  { %854 = vmatpush3.bf16.msra.mxu0 %v1217_v14 }
  0x41   :  { %855 = vmatprep.subr.bf16.mxu0 %v1125_v0 }
  0x42   :  { %838 = vmatpush3.bf16.msra.mxu1 %v1229_v16 }
  0x43   :  { %839 = vmatprep.subr.bf16.mxu1 %v1125_v0 }
  0x44   :  { %856 = vmatpush3.bf16.msra.mxu0 %v1223_v15 }
  0x45   :  { %857 = vmatprep.subr.bf16.mxu0 %v1125_v0 }
  0x46   :  { %840 = vmatpush3.bf16.msra.mxu1 %v1235_v17 }
  0x47   :  { %865 = vmatprep.subr.bf16.mxu1 %v1125_v0 }
  0x48   :  { %858 = vmatpush3.bf16.msra.mxu0 %v1229_v16 }
  0x49   :  { %842 = vmatmul.mubr.bf16.vlgmr.msra.gmra.mrb[0].mxu1 %v1128_v18  ;;  %859 = vmatprep.subr.bf16.mxu0 %v1125_v0 }
  0x4a   :  { %866 = vmatpush3.bf16.msra.mxu1 %v1191_v2  ;;  %881 = vmatprep.mubr.msk.bf16.mxu1 %vm1126_vm0, %v1125_v0 }
  0x4b   :  { %867 = vmatprep.subr.bf16.mxu1 %v1125_v0 }
  0x4c   :  { %860 = vmatpush3.bf16.msra.mxu0 %v1235_v17 }
  0x4d   :  { %885 = vmatprep.subr.bf16.mxu0 %v1125_v0 }
  0x4e   :  { %868 = vmatpush3.bf16.msra.mxu1 %v1194_v3 }
  0x4f   :  { %869 = vmatprep.subr.bf16.mxu1 %v1125_v0 }
  0x52   :  { %870 = vmatpush3.bf16.msra.mxu1 %v1201_v5 }
  0x53   :  { %871 = vmatprep.subr.bf16.mxu1 %v1125_v0 }
  0x56   :  { %872 = vmatpush3.bf16.msra.mxu1 %v1206_v12 }
  0x57   :  { %873 = vmatprep.subr.bf16.mxu1 %v1125_v0 }
  0x5a   :  { %874 = vmatpush3.bf16.msra.mxu1 %v1217_v14 }
  0x5b   :  { %875 = vmatprep.subr.bf16.mxu1 %v1125_v0 }
  0x5e   :  { %876 = vmatpush3.bf16.msra.mxu1 %v1223_v15 }
  0x5f   :  { %877 = vmatprep.subr.bf16.mxu1 %v1125_v0 }
  0x62   :  { %878 = vmatpush3.bf16.msra.mxu1 %v1229_v16 }
  0x63   :  { %879 = vmatprep.subr.bf16.mxu1 %v1125_v0 }
  0x66   :  { %880 = vmatpush3.bf16.msra.mxu1 %v1235_v17 }
  0x67   :  { %905 = vmatprep.subr.bf16.mxu1 %v1125_v0 }
  0xab   :  { %v1274_v36 = vpop.permute.xlu0 %203 }
  0xac   :  { %vm719_vm2 = vcmp.gt.s32.totalorder %v1274_v36, 0  ;;  %vm720_vm4 = vcmp.gt.s32.totalorder %v1274_v36, 1  ;;  %vm721_vm5 = vcmp.gt.s32.totalorder %v1274_v36, 2  ;;  %vm722_vm6 = vcmp.gt.s32.totalorder %v1274_v36, 3 }
  0xad   :  { %vm735_vm3 = vmpackc.low %vm719_vm2, %vm719_vm2  ;;  %vm723_vm7 = vcmp.gt.s32.totalorder %v1274_v36, 4  ;;  %vm724_vm8 = vcmp.gt.s32.totalorder %v1274_v36, 5  ;;  %vm725_vm9 = vcmp.gt.s32.totalorder %v1274_v36, 6  ;;  %vm726_vm10 = vcmp.gt.s32.totalorder %v1274_v36, 7 }
 0x102   :  { %v1270_v25 = vpop.f32.mrb[0].mxu0 }
 0x103   :  { %v122_v26 = vpop.f32.mrb[1].mxu0  ;;  %v729_v55 = vpack.c.bf16 %v1270_v25, %v1270_v25 }
 0x104   :  { %v1272_v27 = vpop.f32.mrb[2].mxu0  ;;  %v727_v29 = vpack.c.bf16 %v122_v26, %v122_v26 }
 0x105   :  { %v125_v28 = vpop.f32.mrb[3].mxu0  ;;  %v396_v56 = vunpack.c.l.bf16 %v729_v55  ;;  %v730_v6 = vpack.c.bf16 %v1272_v27, %v1272_v27 }
 0x106   :  { %v296_v30 = vunpack.c.l.bf16 %v727_v29  ;;  %v728_v44 = vpack.c.bf16 %v125_v28, %v125_v28 }
 0x107   :  { %v447_v7 = vunpack.c.l.bf16 %v730_v6 }
 0x108   :  { %v345_v45 = vunpack.c.l.bf16 %v728_v44 }
 0x10a   :  { %v1295_v40 = vpop.f32.mrb[4].mxu0 }
 0x10b   :  { %v1297_v41 = vpop.f32.mrb[5].mxu0 }
 0x10c   :  { %v1299_v42 = vpop.f32.mrb[6].mxu0  ;;  %v731_v22 = vpack.c.bf16 %v1297_v41, %v1297_v41 }
 0x10d   :  { %v1301_v43 = vpop.f32.mrb[7].mxu0 }
 0x10e   :  { %v498_v23 = vunpack.c.l.bf16 %v731_v22 }
 0x11c   :  { %v290_v31 = vpop.f32.mrb[0].mxu1 }
 0x11d   :  { %v297_v32 = vadd.f32 %v296_v30, %v290_v31  ;;  %v843_v33 = vpop.f32.mrb[1].mxu1 }
 0x11e   :  { %v293_v34 = vpop.f32.mrb[2].mxu1 }
 0x11f   :  { %1007 = vtanh.f32 %v297_v32  ;;  %v844_v35 = vpop.f32.mrb[3].mxu1 }
 0x129   :  { %v1008_v37 = vpop.eup %1007 }
 0x12a   :  { %v736_v38 = vpack.c.bf16 %v1008_v37, %v1008_v37  ;;  %v301_v39 = vsel %vm719_vm2, %v1008_v37, 0.0 }
 0x12b   :  { %302 = vst [vmem:[#allocation8] sm:$0xff] %v301_v39 }
 0x12c   :  { %862 = vmatmul.mubr.msk.bf16.vlgmr.msra.gmra.mrb[8].mxu0 %vm735_vm3, %v736_v38 }
 0x12d   :  { %886 = vmatpush3.bf16.msra.mxu0 %v1191_v2  ;;  %901 = vmatprep.mubr.msk.bf16.mxu0 %vm1126_vm0, %v1125_v0 }
 0x12e   :  { %887 = vmatprep.subr.bf16.mxu0 %v1125_v0 }
 0x131   :  { %888 = vmatpush3.bf16.msra.mxu0 %v1194_v3 }
 0x132   :  { %889 = vmatprep.subr.bf16.mxu0 %v1125_v0 }
 0x135   :  { %890 = vmatpush3.bf16.msra.mxu0 %v1201_v5 }
 0x136   :  { %891 = vmatprep.subr.bf16.mxu0 %v1125_v0 }
 0x139   :  { %892 = vmatpush3.bf16.msra.mxu0 %v1206_v12 }
 0x13a   :  { %893 = vmatprep.subr.bf16.mxu0 %v1125_v0 }
 0x13d   :  { %894 = vmatpush3.bf16.msra.mxu0 %v1217_v14 }
 0x13e   :  { %895 = vmatprep.subr.bf16.mxu0 %v1125_v0 }
 0x141   :  { %896 = vmatpush3.bf16.msra.mxu0 %v1223_v15 }
 0x142   :  { %897 = vmatprep.subr.bf16.mxu0 %v1125_v0 }
 0x145   :  { %898 = vmatpush3.bf16.msra.mxu0 %v1229_v16 }
 0x146   :  { %899 = vmatprep.subr.bf16.mxu0 %v1125_v0 }
 0x149   :  { %900 = vmatpush3.bf16.msra.mxu0 %v1235_v17 }
 0x14a   :  { %925 = vmatprep.subr.bf16.mxu0 %v1125_v0 }
 0x1ff   :  { %v339_v46 = vpop.f32.mrb[8].mxu0 }
 0x200   :  { %v346_v47 = vadd.f32 %v345_v45, %v339_v46  ;;  %v863_v48 = vpop.f32.mrb[9].mxu0 }
 0x201   :  { %v342_v49 = vpop.f32.mrb[10].mxu0 }
 0x202   :  { %1009 = vtanh.f32 %v346_v47  ;;  %v864_v50 = vpop.f32.mrb[11].mxu0  ;;  %v734_v49 = vpack.c.bf16 %v1299_v42, %v1299_v42 }
 0x204   :  { %v651_v50 = vunpack.c.l.bf16 %v734_v49 }
 0x20c   :  { %v1010_v51 = vpop.eup %1009 }
 0x20d   :  { %v351_v52 = vsel %vm720_vm4, %v1010_v51, 0.0  ;;  %v354_v53 = vsel %vm720_vm4, %v1010_v51, %v301_v39 }
 0x20e   :  { %353 = vst [vmem:[#allocation8 + $0x8] sm:$0xff] %v351_v52  ;;  %v355_v54 = vpack.c.bf16 %v354_v53, %v354_v53 }
 0x210   :  { %882 = vmatmul.mubr.bf16.vlgmr.msra.gmra.mrb[4].mxu1 %v355_v54 }
 0x211   :  { %906 = vmatpush3.bf16.msra.mxu1 %v1191_v2  ;;  %921 = vmatprep.mubr.msk.bf16.mxu1 %vm1126_vm0, %v1125_v0 }
 0x212   :  { %907 = vmatprep.subr.bf16.mxu1 %v1125_v0 }
 0x215   :  { %908 = vmatpush3.bf16.msra.mxu1 %v1194_v3 }
 0x216   :  { %909 = vmatprep.subr.bf16.mxu1 %v1125_v0 }
 0x219   :  { %910 = vmatpush3.bf16.msra.mxu1 %v1201_v5 }
 0x21a   :  { %911 = vmatprep.subr.bf16.mxu1 %v1125_v0 }
 0x21d   :  { %912 = vmatpush3.bf16.msra.mxu1 %v1206_v12 }
 0x21e   :  { %913 = vmatprep.subr.bf16.mxu1 %v1125_v0 }
 0x221   :  { %914 = vmatpush3.bf16.msra.mxu1 %v1217_v14 }
 0x222   :  { %915 = vmatprep.subr.bf16.mxu1 %v1125_v0 }
 0x225   :  { %916 = vmatpush3.bf16.msra.mxu1 %v1223_v15 }
 0x226   :  { %917 = vmatprep.subr.bf16.mxu1 %v1125_v0 }
 0x229   :  { %918 = vmatpush3.bf16.msra.mxu1 %v1229_v16 }
 0x22a   :  { %919 = vmatprep.subr.bf16.mxu1 %v1125_v0 }
 0x22d   :  { %920 = vmatpush3.bf16.msra.mxu1 %v1235_v17 }
 0x22e   :  { %945 = vmatprep.subr.bf16.mxu1 %v1125_v0 }
 0x2e3   :  { %v390_v57 = vpop.f32.mrb[4].mxu1 }
 0x2e4   :  { %v397_v58 = vadd.f32 %v396_v56, %v390_v57  ;;  %v883_v59 = vpop.f32.mrb[5].mxu1 }
 0x2e5   :  { %v393_v60 = vpop.f32.mrb[6].mxu1 }
 0x2e6   :  { %1011 = vtanh.f32 %v397_v58  ;;  %v884_v61 = vpop.f32.mrb[7].mxu1 }
 0x2f0   :  { %v1012_v62 = vpop.eup %1011 }
 0x2f1   :  { %v402_v63 = vsel %vm721_vm5, %v1012_v62, 0.0  ;;  %v405_v1 = vsel %vm721_vm5, %v1012_v62, %v354_v53 }
 0x2f2   :  { %404 = vst [vmem:[#allocation8 + $0x10] sm:$0xff] %v402_v63  ;;  %v406_v4 = vpack.c.bf16 %v405_v1, %v405_v1 }
 0x2f4   :  { %902 = vmatmul.mubr.bf16.vlgmr.msra.gmra.mrb[12].mxu0 %v406_v4 }
 0x2f5   :  { %926 = vmatpush3.bf16.msra.mxu0 %v1191_v2  ;;  %941 = vmatprep.mubr.msk.bf16.mxu0 %vm1126_vm0, %v1125_v0 }
 0x2f6   :  { %927 = vmatprep.subr.bf16.mxu0 %v1125_v0 }
 0x2f9   :  { %928 = vmatpush3.bf16.msra.mxu0 %v1194_v3 }
 0x2fa   :  { %929 = vmatprep.subr.bf16.mxu0 %v1125_v0 }
 0x2fd   :  { %930 = vmatpush3.bf16.msra.mxu0 %v1201_v5 }
 0x2fe   :  { %931 = vmatprep.subr.bf16.mxu0 %v1125_v0 }
 0x301   :  { %932 = vmatpush3.bf16.msra.mxu0 %v1206_v12 }
 0x302   :  { %933 = vmatprep.subr.bf16.mxu0 %v1125_v0 }
 0x305   :  { %934 = vmatpush3.bf16.msra.mxu0 %v1217_v14 }
 0x306   :  { %935 = vmatprep.subr.bf16.mxu0 %v1125_v0 }
 0x309   :  { %936 = vmatpush3.bf16.msra.mxu0 %v1223_v15 }
 0x30a   :  { %937 = vmatprep.subr.bf16.mxu0 %v1125_v0 }
 0x30d   :  { %938 = vmatpush3.bf16.msra.mxu0 %v1229_v16 }
 0x30e   :  { %939 = vmatprep.subr.bf16.mxu0 %v1125_v0 }
 0x311   :  { %940 = vmatpush3.bf16.msra.mxu0 %v1235_v17 }
 0x312   :  { %965 = vmatprep.subr.bf16.mxu0 %v1125_v0 }
 0x3c7   :  { %v441_v8 = vpop.f32.mrb[12].mxu0 }
 0x3c8   :  { %v448_v9 = vadd.f32 %v447_v7, %v441_v8  ;;  %v903_v10 = vpop.f32.mrb[13].mxu0 }
 0x3c9   :  { %v444_v11 = vpop.f32.mrb[14].mxu0 }
 0x3ca   :  { %1013 = vtanh.f32 %v448_v9  ;;  %v904_v13 = vpop.f32.mrb[15].mxu0 }
 0x3d4   :  { %v1014_v18 = vpop.eup %1013 }
 0x3d5   :  { %v453_v19 = vsel %vm722_vm6, %v1014_v18, 0.0  ;;  %v456_v20 = vsel %vm722_vm6, %v1014_v18, %v405_v1 }
 0x3d6   :  { %455 = vst [vmem:[#allocation8 + $0x18] sm:$0xff] %v453_v19  ;;  %v457_v21 = vpack.c.bf16 %v456_v20, %v456_v20 }
 0x3d8   :  { %922 = vmatmul.mubr.bf16.vlgmr.msra.gmra.mrb[8].mxu1 %v457_v21 }
 0x3d9   :  { %946 = vmatpush3.bf16.msra.mxu1 %v1191_v2  ;;  %961 = vmatprep.mubr.msk.bf16.mxu1 %vm1126_vm0, %v1125_v0 }
 0x3da   :  { %947 = vmatprep.subr.bf16.mxu1 %v1125_v0 }
 0x3dd   :  { %948 = vmatpush3.bf16.msra.mxu1 %v1194_v3 }
 0x3de   :  { %949 = vmatprep.subr.bf16.mxu1 %v1125_v0 }
 0x3e1   :  { %950 = vmatpush3.bf16.msra.mxu1 %v1201_v5 }
 0x3e2   :  { %951 = vmatprep.subr.bf16.mxu1 %v1125_v0 }
 0x3e5   :  { %952 = vmatpush3.bf16.msra.mxu1 %v1206_v12 }
 0x3e6   :  { %953 = vmatprep.subr.bf16.mxu1 %v1125_v0 }
 0x3e9   :  { %954 = vmatpush3.bf16.msra.mxu1 %v1217_v14 }
 0x3ea   :  { %955 = vmatprep.subr.bf16.mxu1 %v1125_v0 }
 0x3ed   :  { %956 = vmatpush3.bf16.msra.mxu1 %v1223_v15 }
 0x3ee   :  { %957 = vmatprep.subr.bf16.mxu1 %v1125_v0 }
 0x3f1   :  { %958 = vmatpush3.bf16.msra.mxu1 %v1229_v16 }
 0x3f2   :  { %959 = vmatprep.subr.bf16.mxu1 %v1125_v0 }
 0x3f5   :  { %960 = vmatpush3.bf16.msra.mxu1 %v1235_v17 }
 0x4ab   :  { %v492_v24 = vpop.f32.mrb[8].mxu1 }
 0x4ac   :  { %v499_v25 = vadd.f32 %v498_v23, %v492_v24  ;;  %v923_v26 = vpop.f32.mrb[9].mxu1 }
 0x4ad   :  { %v495_v27 = vpop.f32.mrb[10].mxu1 }
 0x4ae   :  { %1015 = vtanh.f32 %v499_v25  ;;  %v924_v28 = vpop.f32.mrb[11].mxu1 }
 0x4b8   :  { %v1016_v29 = vpop.eup %1015 }
 0x4b9   :  { %v504_v30 = vsel %vm723_vm7, %v1016_v29, 0.0  ;;  %v507_v31 = vsel %vm723_vm7, %v1016_v29, %v456_v20 }
 0x4ba   :  { %506 = vst [vmem:[#allocation8 + $0x20] sm:$0xff] %v504_v30  ;;  %v508_v32 = vpack.c.bf16 %v507_v31, %v507_v31 }
 0x4bc   :  { %942 = vmatmul.mubr.bf16.vlgmr.msra.gmra.mrb[16].mxu0 %v508_v32 }
 0x4bd   :  { %966 = vmatpush3.bf16.msra.mxu0 %v1191_v2  ;;  %981 = vmatprep.mubr.msk.bf16.mxu0 %vm1126_vm0, %v1125_v0  ;;  %v732_v2 = vpack.c.bf16 %v1301_v43, %v1301_v43 }
 0x4be   :  { %967 = vmatprep.subr.bf16.mxu0 %v1125_v0 }
 0x4c1   :  { %968 = vmatpush3.bf16.msra.mxu0 %v1194_v3  ;;  %v549_v3 = vunpack.c.l.bf16 %v732_v2 }
 0x4c2   :  { %969 = vmatprep.subr.bf16.mxu0 %v1125_v0 }
 0x4c5   :  { %970 = vmatpush3.bf16.msra.mxu0 %v1201_v5 }
 0x4c6   :  { %971 = vmatprep.subr.bf16.mxu0 %v1125_v0 }
 0x4c9   :  { %972 = vmatpush3.bf16.msra.mxu0 %v1206_v12 }
 0x4ca   :  { %973 = vmatprep.subr.bf16.mxu0 %v1125_v0 }
 0x4cd   :  { %974 = vmatpush3.bf16.msra.mxu0 %v1217_v14 }
 0x4ce   :  { %975 = vmatprep.subr.bf16.mxu0 %v1125_v0 }
 0x4d1   :  { %976 = vmatpush3.bf16.msra.mxu0 %v1223_v15 }
 0x4d2   :  { %977 = vmatprep.subr.bf16.mxu0 %v1125_v0 }
 0x4d5   :  { %978 = vmatpush3.bf16.msra.mxu0 %v1229_v16 }
 0x4d6   :  { %979 = vmatprep.subr.bf16.mxu0 %v1125_v0  ;;  %v733_v0 = vpack.c.bf16 %v1295_v40, %v1295_v40 }
 0x4d9   :  { %980 = vmatpush3.bf16.msra.mxu0 %v1235_v17  ;;  %v600_v17 = vunpack.c.l.bf16 %v733_v0 }
 0x58f   :  { %v543_v5 = vpop.f32.mrb[16].mxu0 }
 0x590   :  { %v550_v12 = vadd.f32 %v549_v3, %v543_v5  ;;  %v943_v33 = vpop.f32.mrb[17].mxu0 }
 0x591   :  { %v546_v14 = vpop.f32.mrb[18].mxu0 }
 0x592   :  { %1017 = vtanh.f32 %v550_v12  ;;  %v944_v34 = vpop.f32.mrb[19].mxu0 }
 0x59c   :  { %v1018_v35 = vpop.eup %1017 }
 0x59d   :  { %v555_v15 = vsel %vm724_vm8, %v1018_v35, 0.0  ;;  %v558_v37 = vsel %vm724_vm8, %v1018_v35, %v507_v31 }
 0x59e   :  { %557 = vst [vmem:[#allocation8 + $0x28] sm:$0xff] %v555_v15  ;;  %v559_v16 = vpack.c.bf16 %v558_v37, %v558_v37 }
 0x5a0   :  { %962 = vmatmul.mubr.bf16.vlgmr.msra.gmra.mrb[12].mxu1 %v559_v16 }
 0x673   :  { %v594_v38 = vpop.f32.mrb[12].mxu1 }
 0x674   :  { %v601_v39 = vadd.f32 %v600_v17, %v594_v38  ;;  %v963_v41 = vpop.f32.mrb[13].mxu1 }
 0x675   :  { %v597_v43 = vpop.f32.mrb[14].mxu1 }
 0x676   :  { %1019 = vtanh.f32 %v601_v39  ;;  %v964_v44 = vpop.f32.mrb[15].mxu1 }
 0x680   :  { %v1020_v45 = vpop.eup %1019 }
 0x681   :  { %v606_v46 = vsel %vm725_vm9, %v1020_v45, 0.0  ;;  %v609_v47 = vsel %vm725_vm9, %v1020_v45, %v558_v37 }
 0x682   :  { %608 = vst [vmem:[#allocation8 + $0x30] sm:$0xff] %v606_v46  ;;  %v610_v48 = vpack.c.bf16 %v609_v47, %v609_v47 }
 0x684   :  { %982 = vmatmul.mubr.bf16.vlgmr.msra.gmra.mrb[20].mxu0 %v610_v48 }
 0x757   :  { %v645_v40 = vpop.f32.mrb[20].mxu0 }
 0x758   :  { %v652_v51 = vadd.f32 %v651_v50, %v645_v40  ;;  %v983_v52 = vpop.f32.mrb[21].mxu0 }
 0x759   :  { %v648_v53 = vpop.f32.mrb[22].mxu0 }
 0x75a   :  { %1021 = vtanh.f32 %v652_v51  ;;  %v984_v54 = vpop.f32.mrb[23].mxu0 }
 0x764   :  { %v1022_v55 = vpop.eup %1021 }
 0x765   :  { %v657_v56 = vsel %vm726_vm10, %v1022_v55, 0.0  ;;  %v660_v57 = vsel %vm726_vm10, %v1022_v55, %v609_v47 }
 0x766   :  { %659 = vst [vmem:[#allocation8 + $0x38] sm:$0xff] %v657_v56  ;;  %665 = vst [vmem:[#allocation9] sm:$0xff] %v660_v57 }
 0x767   :  { %1078 = shalt.err (!%p1075_p6)
}
 0x768   :  { %s1079_s30 = scalar_lea.hbm %s1423_s4, 1024 }
 0x769   :  { %p1080_p7 = scmp.ne.s32.totalorder %s1423_s4, %s1079_s30  ;;  %p1083_p8 = scmp.lt.u32.totalorder %s1079_s30, %s1423_s4 }
 0x76b   :  { %p1085_p9 = pnand %p1083_p8, %p1080_p7 }
 0x76d   :  { %1088 = shalt.err (!%p1085_p9)
}
 0x76e   :  { %677 = dma.vmem_to_hbm [thread:$0]  %s672_s22, 1024, %s1423_s4, [#allocation5], %s1120_s28, %s1120_s28, %s1121_s29  }
 0x76f   :  { %s1089_s12 = scalar_lea.vmem %s685_s24, 128  ;;  %p1094_p11 = scmp.lt.s32.totalorder %s685_s24, %s685_s24 }
 0x770   :  { %p1090_p10 = scmp.ne.s32.totalorder %s685_s24, %s1089_s12  ;;  %p1095_p12 = scmp.lt.s32.totalorder %s1089_s12, %s1089_s12 }
 0x772   :  { %p1096_p13 = por %p1095_p12, %p1094_p11 }
 0x774   :  { %p1097_p0 = pnand %p1096_p13, %p1090_p10 }
 0x776   :  { %1100 = shalt.err (!%p1097_p0)
}
 0x777   :  { %s1101_s15 = scalar_lea.hbm %s1424_s5, 128 }
 0x778   :  { %p1102_p1 = scmp.ne.s32.totalorder %s1424_s5, %s1101_s15  ;;  %p1105_p2 = scmp.lt.u32.totalorder %s1101_s15, %s1424_s5 }
 0x77a   :  { %p1107_p3 = pnand %p1105_p2, %p1102_p1 }
 0x77c   :  { %1110 = shalt.err (!%p1107_p3)
}
 0x77d   :  { %687 = dma.vmem_to_hbm [thread:$0]  %s685_s24, 128, %s1424_s5, [#allocation10]  }
 0x77e   :  { %1115 = dma.done.wait [#allocation5], 1024  }
 0x77f   :  { %1116 = vsyncadd [#allocation5], 4294966272 }
 0x780   :  { %1117 = dma.done.wait [#allocation10], 128  }
 0x781   :  { %1118 = vsyncadd [#allocation10], 4294967168 }
 0x782   :  { %694 = vsyncpa [#allocation4], 1 }
 0x783   :  { %695 = vsyncpa [#allocation7], 1 }
 0x784   :  { %696 = vsyncpa [#allocation5], 1 }
 0x785   :  { %697 = vsyncpa [#allocation10], 1 }

</bundles_post_ra>
